<compile_context>
chip_gen: v6e
topology: v6e:2x2x1
jax: 0.10.0
libtpu: 0.0.40
codegen_flags: <defaults>
</compile_context>

<pallas_src>
import numpy as np
import jax
import jax.numpy as jnp
from jax.experimental import pallas as pl
from jax.experimental.pallas import tpu as pltpu

# ---------------- hyperparameters (mirror the PyTorch globals) ----------------
N_HEAD = 4
D_HEAD = 8
D_MODEL = N_HEAD * D_HEAD      # elementwise D_space * Wv requires n_head*d_head == d_model
SEQ = 8                        # qlen == klen == ntokens
BATCH = 2
JUMP_STEP = 1
MULTI_STEP_NUM = 1
NT = SEQ + JUMP_STEP - 1       # so ntokens = Nt - jump_step + 1 == SEQ
NTOKENS = NT - JUMP_STEP + 1
NX = D_MODEL
SCALE = 1.0 / (D_HEAD ** 0.5)
TOKENS = SEQ * BATCH           # flattened (seq, batch) token count


# ---------------- parameter / mask setup (plain numpy / JAX glue) ----------------
def generate_Dspace(sz: int, a: int, b: int) -> jnp.ndarray:
    I = np.eye(sz, dtype=np.float32)
    D = I.copy()
    if a > 0: D += np.roll(I, 1, axis=0)
    if a > 1: D += np.roll(I, 2, axis=0)
    if a > 2: D += np.roll(I, 3, axis=0)
    if b > 0: D += np.roll(I, -1, axis=0)
    if b > 1: D += np.roll(I, -2, axis=0)
    return jnp.asarray(D)


def soft_max_mask(sz: int, num_step: int) -> jnp.ndarray:
    coeff = {1: [1.0], 2: [3/2, -1/2], 3: [23/12, -16/12, 5/12],
             4: [55/24, -59/24, 37/24, -9/24]}
    c = coeff[num_step]
    K = np.zeros((sz, sz), dtype=np.float32)
    for iii in range(num_step):
        K += c[iii] * np.diag(np.ones(sz - iii, dtype=np.float32), k=-iii)
    for iii in range(num_step - 1):
        cc = coeff[iii + 1]
        for jjj in range(iii + 1):
            K[iii, jjj] = cc[iii - jjj]
    return jnp.asarray(K)


# ---------------- host-side, one-time parameter preparation ----------------
def prepare_params(wq, wk, wdx, wdud, mask):
    """Fuse the four used (n_head*d_head, d_model) weights into ONE
    pre-transposed 2-D weight (d_model, 4*n_head*d_head) = (32, 128) with the
    attention scale folded into the q columns.  WDu (identity) is dropped.
    Also build the block-diagonal batch mask."""
    w_fused = jnp.concatenate(
        [wq.T * SCALE,     # q columns (scale folded in)
         wk.T,             # k columns
         wdx.T,            # WDx   (d2u/dx2 weight)
         wdud.T],          # WDud  (u*du/dx weight)
        axis=1)            # (D_MODEL, 4*N_HEAD*D_HEAD) == (32, 128): lane-dense

    # big_mask[i*B+bi, j*B+bj] = mask[i, j] * (bi == bj) — zeroes cross-batch
    # score entries so one (S*B)x(S*B) attention reproduces per-batch attention.
    big_mask = jnp.kron(mask, jnp.eye(BATCH, dtype=mask.dtype))   # (S*B, S*B)
    return w_fused, big_mask


# ---------------- Pallas kernel: whole problem in one invocation ----------------
def mha_kernel(h_ref, w_ref, mask_ref, out_ref):
    h = h_ref[...]                                        # (T, D) = (16, 32)
    mask = mask_ref[...]                                  # (T, T) block-diag soft_max_mask

    # single fused, lane-dense projection: (16,32) @ (32,128) -> (16,128)
    proj = jnp.dot(h, w_ref[...], preferred_element_type=jnp.float32)

    q_all   = proj[:, 0 * D_MODEL:1 * D_MODEL]            # (T, 32), scale folded in
    k_all   = proj[:, 1 * D_MODEL:2 * D_MODEL]
    dx_all  = proj[:, 2 * D_MODEL:3 * D_MODEL]
    dud_all = proj[:, 3 * D_MODEL:4 * D_MODEL]

    # PDE-style value transform: v = h@WDx.T + (h@WDu.T) * (h@WDud.T).
    # WDu is the identity in this configuration, so (h @ WDu.T) == h.
    v_all = dx_all + h * dud_all                          # (T, 32)

    dn = (((1,), (1,)), ((), ()))                         # contract last dims: A @ B.T
    head_outs = []
    for n in range(N_HEAD):                               # static unroll; slices are free
        sl = slice(n * D_HEAD, (n + 1) * D_HEAD)
        s = jax.lax.dot_general(q_all[:, sl], k_all[:, sl], dn,
                                preferred_element_type=jnp.float32)   # (T, T)
        s = mask * s                                      # cross-batch entries -> 0
        denom = jnp.sum(s, axis=-1, keepdims=True) + 1e-6
        p = s / denom                                     # exact division (no approx recip)
        head_outs.append(jnp.dot(p, v_all[:, sl],
                                 preferred_element_type=jnp.float32))  # (T, Dh)

    # single lane-dense store of the whole output slab (no per-head masked stores)
    out_ref[...] = jnp.concatenate(head_outs, axis=-1).astype(out_ref.dtype)


def multihead_attention(h_sbd, w_fused, big_mask):
    """h_sbd: (seq, batch, d_model) like PyTorch; returns (seq, batch, n_head*d_head)."""
    S, B, D = h_sbd.shape
    T = S * B
    h2 = h_sbd.reshape(T, D)                       # free reshape, no transpose
    out = pl.pallas_call(
        mha_kernel,
        out_shape=jax.ShapeDtypeStruct((T, D_MODEL), jnp.float32),
        # no grid: everything lives in VMEM for the single invocation
        in_specs=[
            pl.BlockSpec(memory_space=pltpu.MemorySpace.VMEM),   # h (flattened tokens)
            pl.BlockSpec(memory_space=pltpu.MemorySpace.VMEM),   # fused (32,128) weight
            pl.BlockSpec(memory_space=pltpu.MemorySpace.VMEM),   # block-diag soft_max_mask
        ],
        out_specs=pl.BlockSpec(memory_space=pltpu.MemorySpace.VMEM),
    )(h2, w_fused, big_mask)
    return out.reshape(S, B, D_MODEL)              # free reshape back to (S, B, D)


# ---------------- pure-JAX reference (mirrors the PyTorch forward) ----------------
def reference(h, wq, wk, wdx, wdud, wdu, mask):
    hp = jax.lax.Precision.HIGHEST
    S, B, D = h.shape
    q = jnp.einsum('sbm,dm->sbd', h, wq, precision=hp)
    k = jnp.einsum('sbm,dm->sbd', h, wk, precision=hp)
    hv = jnp.transpose(h, (1, 0, 2))
    v = (jnp.einsum('bsm,dm->bsd', hv, wdx, precision=hp)
         + jnp.einsum('bsm,dm->bsd', hv, wdu, precision=hp)
         * jnp.einsum('bsm,dm->bsd', hv, wdud, precision=hp))
    v = jnp.transpose(v, (1, 0, 2))
    q = q.reshape(S, B, N_HEAD, D_HEAD)
    k = k.reshape(S, B, N_HEAD, D_HEAD)
    v = v.reshape(S, B, N_HEAD, D_HEAD)
    score = jnp.einsum('ibnd,jbnd->ijbn', q, k, precision=hp) * SCALE
    score = mask[:, :, None, None] * score
    prob = score / (jnp.sum(score, axis=1, keepdims=True) + 1e-6)
    vec = jnp.einsum('ijbn,jbnd->ibnd', prob, v, precision=hp)
    return vec.reshape(S, B, N_HEAD * D_HEAD)


if __name__ == "__main__":
    key = jax.random.PRNGKey(0)
    k_h, k_q, k_k, k_v, k_v2 = jax.random.split(key, 5)

    # deterministic parameter init (normal(0, 0.01) like the module)
    wq = 0.01 * jax.random.normal(k_q, (N_HEAD * D_HEAD, D_MODEL), jnp.float32)
    wk = 0.01 * jax.random.normal(k_k, (N_HEAD * D_HEAD, D_MODEL), jnp.float32)
    Wv = 0.01 * jax.random.normal(k_v, (N_HEAD * D_HEAD, D_MODEL), jnp.float32)
    Wv2 = 0.01 * jax.random.normal(k_v2, (N_HEAD * D_HEAD, D_MODEL), jnp.float32)

    # precombined "derivative" weights (pure elementwise parameter setup)
    D_du2dx2 = generate_Dspace(D_MODEL, 1, 1)
    D_ududx = generate_Dspace(D_MODEL, 1, 0)
    D_u = generate_Dspace(D_MODEL, 0, 0)           # identity (used only by the reference)
    WDx = (NX / (2.0 * np.pi)) * D_du2dx2 * Wv2
    WDud = D_ududx * Wv
    WDu = D_u

    mask = soft_max_mask(NTOKENS, MULTI_STEP_NUM)  # (SEQ, SEQ)

    # one-time fusion of weights (WDu dropped: identity) + block-diagonal batch mask
    w_fused, big_mask = prepare_params(wq, wk, WDx, WDud, mask)

    # input h: (seq, batch, d_model) — PyTorch layout
    h = jax.random.normal(k_h, (SEQ, BATCH, D_MODEL), jnp.float32)

    out = multihead_attention(h, w_fused, big_mask)
    out = jax.block_until_ready(out)

    ref = reference(h, wq, wk, WDx, WDud, WDu, mask)
    assert out.shape == (SEQ, BATCH, N_HEAD * D_HEAD)
    np.testing.assert_allclose(np.asarray(out), np.asarray(ref), rtol=2e-3, atol=5e-4)

    print("KERNEL_OK")
</pallas_src>

<mosaic_0001>
module attributes {stable_mosaic.version = 11 : i64} {
  func.func @mha_kernel(%arg0: memref<16x32xf32, #tpu.memory_space<vmem>>, %arg1: memref<32x128xf32, #tpu.memory_space<vmem>>, %arg2: memref<16x16xf32, #tpu.memory_space<vmem>>, %arg3: memref<16x32xf32, #tpu.memory_space<vmem>>) attributes {dimension_semantics = [], scalar_prefetch = 0 : i64, scratch_operands = 0 : i64, tpu.core_type = #tpu.core_type<tc>} {
    %c0 = arith.constant 0 : index
    %c0_0 = arith.constant 0 : index
    %0 = vector.load %arg0[%c0, %c0_0] : memref<16x32xf32, #tpu.memory_space<vmem>>, vector<16x32xf32>
    %c0_1 = arith.constant 0 : index
    %c0_2 = arith.constant 0 : index
    %1 = vector.load %arg2[%c0_1, %c0_2] : memref<16x16xf32, #tpu.memory_space<vmem>>, vector<16x16xf32>
    %c0_3 = arith.constant 0 : index
    %c0_4 = arith.constant 0 : index
    %2 = vector.load %arg1[%c0_3, %c0_4] : memref<32x128xf32, #tpu.memory_space<vmem>>, vector<32x128xf32>
    %cst = arith.constant dense<0.000000e+00> : vector<16x128xf32>
    %3 = tpu.matmul %0, %2, %cst {dimension_numbers = #tpu.dot_dimension_numbers<[1], [0], [0], [1], [0, 0, 1, 1], [], []>} : vector<16x32xf32>, vector<32x128xf32>, vector<16x128xf32> -> vector<16x128xf32>
    %4 = vector.extract_strided_slice %3 {offsets = [0, 0], sizes = [16, 32], strides = [1, 1]} : vector<16x128xf32> to vector<16x32xf32>
    %5 = vector.extract_strided_slice %3 {offsets = [0, 32], sizes = [16, 32], strides = [1, 1]} : vector<16x128xf32> to vector<16x32xf32>
    %6 = vector.extract_strided_slice %3 {offsets = [0, 64], sizes = [16, 32], strides = [1, 1]} : vector<16x128xf32> to vector<16x32xf32>
    %7 = vector.extract_strided_slice %3 {offsets = [0, 96], sizes = [16, 32], strides = [1, 1]} : vector<16x128xf32> to vector<16x32xf32>
    %8 = arith.mulf %0, %7 : vector<16x32xf32>
    %9 = arith.addf %6, %8 : vector<16x32xf32>
    %10 = vector.extract_strided_slice %4 {offsets = [0, 0], sizes = [16, 8], strides = [1, 1]} : vector<16x32xf32> to vector<16x8xf32>
    %11 = vector.extract_strided_slice %5 {offsets = [0, 0], sizes = [16, 8], strides = [1, 1]} : vector<16x32xf32> to vector<16x8xf32>
    %cst_5 = arith.constant dense<0.000000e+00> : vector<16x16xf32>
    %12 = tpu.matmul %10, %11, %cst_5 {dimension_numbers = #tpu.dot_dimension_numbers<[1], [1], [0], [0], [0, 0, 1, 0], [], []>} : vector<16x8xf32>, vector<16x8xf32>, vector<16x16xf32> -> vector<16x16xf32>
    %13 = arith.mulf %1, %12 : vector<16x16xf32>
    %cst_6 = arith.constant dense<0.000000e+00> : vector<16xf32>
    %14 = vector.multi_reduction <add>, %13, %cst_6 [1] : vector<16x16xf32> to vector<16xf32>
    %15 = vector.shape_cast %14 : vector<16xf32> to vector<16x1xf32>
    %cst_7 = arith.constant 9.99999997E-7 : f32
    %16 = vector.broadcast %cst_7 : f32 to vector<16x1xf32>
    %17 = arith.addf %15, %16 : vector<16x1xf32>
    %18 = vector.broadcast %17 : vector<16x1xf32> to vector<16x16xf32>
    %19 = arith.divf %13, %18 : vector<16x16xf32>
    %20 = vector.extract_strided_slice %9 {offsets = [0, 0], sizes = [16, 8], strides = [1, 1]} : vector<16x32xf32> to vector<16x8xf32>
    %cst_8 = arith.constant dense<0.000000e+00> : vector<16x8xf32>
    %21 = tpu.matmul %19, %20, %cst_8 {dimension_numbers = #tpu.dot_dimension_numbers<[1], [0], [0], [1], [0, 0, 1, 1], [], []>} : vector<16x16xf32>, vector<16x8xf32>, vector<16x8xf32> -> vector<16x8xf32>
    %22 = vector.extract_strided_slice %4 {offsets = [0, 8], sizes = [16, 8], strides = [1, 1]} : vector<16x32xf32> to vector<16x8xf32>
    %23 = vector.extract_strided_slice %5 {offsets = [0, 8], sizes = [16, 8], strides = [1, 1]} : vector<16x32xf32> to vector<16x8xf32>
    %cst_9 = arith.constant dense<0.000000e+00> : vector<16x16xf32>
    %24 = tpu.matmul %22, %23, %cst_9 {dimension_numbers = #tpu.dot_dimension_numbers<[1], [1], [0], [0], [0, 0, 1, 0], [], []>} : vector<16x8xf32>, vector<16x8xf32>, vector<16x16xf32> -> vector<16x16xf32>
    %25 = arith.mulf %1, %24 : vector<16x16xf32>
    %cst_10 = arith.constant dense<0.000000e+00> : vector<16xf32>
    %26 = vector.multi_reduction <add>, %25, %cst_10 [1] : vector<16x16xf32> to vector<16xf32>
    %27 = vector.shape_cast %26 : vector<16xf32> to vector<16x1xf32>
    %cst_11 = arith.constant 9.99999997E-7 : f32
    %28 = vector.broadcast %cst_11 : f32 to vector<16x1xf32>
    %29 = arith.addf %27, %28 : vector<16x1xf32>
    %30 = vector.broadcast %29 : vector<16x1xf32> to vector<16x16xf32>
    %31 = arith.divf %25, %30 : vector<16x16xf32>
    %32 = vector.extract_strided_slice %9 {offsets = [0, 8], sizes = [16, 8], strides = [1, 1]} : vector<16x32xf32> to vector<16x8xf32>
    %cst_12 = arith.constant dense<0.000000e+00> : vector<16x8xf32>
    %33 = tpu.matmul %31, %32, %cst_12 {dimension_numbers = #tpu.dot_dimension_numbers<[1], [0], [0], [1], [0, 0, 1, 1], [], []>} : vector<16x16xf32>, vector<16x8xf32>, vector<16x8xf32> -> vector<16x8xf32>
    %34 = vector.extract_strided_slice %4 {offsets = [0, 16], sizes = [16, 8], strides = [1, 1]} : vector<16x32xf32> to vector<16x8xf32>
    %35 = vector.extract_strided_slice %5 {offsets = [0, 16], sizes = [16, 8], strides = [1, 1]} : vector<16x32xf32> to vector<16x8xf32>
    %cst_13 = arith.constant dense<0.000000e+00> : vector<16x16xf32>
    %36 = tpu.matmul %34, %35, %cst_13 {dimension_numbers = #tpu.dot_dimension_numbers<[1], [1], [0], [0], [0, 0, 1, 0], [], []>} : vector<16x8xf32>, vector<16x8xf32>, vector<16x16xf32> -> vector<16x16xf32>
    %37 = arith.mulf %1, %36 : vector<16x16xf32>
    %cst_14 = arith.constant dense<0.000000e+00> : vector<16xf32>
    %38 = vector.multi_reduction <add>, %37, %cst_14 [1] : vector<16x16xf32> to vector<16xf32>
    %39 = vector.shape_cast %38 : vector<16xf32> to vector<16x1xf32>
    %cst_15 = arith.constant 9.99999997E-7 : f32
    %40 = vector.broadcast %cst_15 : f32 to vector<16x1xf32>
    %41 = arith.addf %39, %40 : vector<16x1xf32>
    %42 = vector.broadcast %41 : vector<16x1xf32> to vector<16x16xf32>
    %43 = arith.divf %37, %42 : vector<16x16xf32>
    %44 = vector.extract_strided_slice %9 {offsets = [0, 16], sizes = [16, 8], strides = [1, 1]} : vector<16x32xf32> to vector<16x8xf32>
    %cst_16 = arith.constant dense<0.000000e+00> : vector<16x8xf32>
    %45 = tpu.matmul %43, %44, %cst_16 {dimension_numbers = #tpu.dot_dimension_numbers<[1], [0], [0], [1], [0, 0, 1, 1], [], []>} : vector<16x16xf32>, vector<16x8xf32>, vector<16x8xf32> -> vector<16x8xf32>
    %46 = vector.extract_strided_slice %4 {offsets = [0, 24], sizes = [16, 8], strides = [1, 1]} : vector<16x32xf32> to vector<16x8xf32>
    %47 = vector.extract_strided_slice %5 {offsets = [0, 24], sizes = [16, 8], strides = [1, 1]} : vector<16x32xf32> to vector<16x8xf32>
    %cst_17 = arith.constant dense<0.000000e+00> : vector<16x16xf32>
    %48 = tpu.matmul %46, %47, %cst_17 {dimension_numbers = #tpu.dot_dimension_numbers<[1], [1], [0], [0], [0, 0, 1, 0], [], []>} : vector<16x8xf32>, vector<16x8xf32>, vector<16x16xf32> -> vector<16x16xf32>
    %49 = arith.mulf %1, %48 : vector<16x16xf32>
    %cst_18 = arith.constant dense<0.000000e+00> : vector<16xf32>
    %50 = vector.multi_reduction <add>, %49, %cst_18 [1] : vector<16x16xf32> to vector<16xf32>
    %51 = vector.shape_cast %50 : vector<16xf32> to vector<16x1xf32>
    %cst_19 = arith.constant 9.99999997E-7 : f32
    %52 = vector.broadcast %cst_19 : f32 to vector<16x1xf32>
    %53 = arith.addf %51, %52 : vector<16x1xf32>
    %54 = vector.broadcast %53 : vector<16x1xf32> to vector<16x16xf32>
    %55 = arith.divf %49, %54 : vector<16x16xf32>
    %56 = vector.extract_strided_slice %9 {offsets = [0, 24], sizes = [16, 8], strides = [1, 1]} : vector<16x32xf32> to vector<16x8xf32>
    %cst_20 = arith.constant dense<0.000000e+00> : vector<16x8xf32>
    %57 = tpu.matmul %55, %56, %cst_20 {dimension_numbers = #tpu.dot_dimension_numbers<[1], [0], [0], [1], [0, 0, 1, 1], [], []>} : vector<16x16xf32>, vector<16x8xf32>, vector<16x8xf32> -> vector<16x8xf32>
    %58 = tpu.concatenate %21, %33, %45, %57 in 1 : vector<16x8xf32>, vector<16x8xf32>, vector<16x8xf32>, vector<16x8xf32> -> vector<16x32xf32>
    %c0_21 = arith.constant 0 : index
    %c0_22 = arith.constant 0 : index
    %59 = vector.load %arg3[%c0_21, %c0_22] : memref<16x32xf32, #tpu.memory_space<vmem>>, vector<16x32xf32>
    tpu.vector_store %arg3[%c0_21, %c0_22], %58 {strides = array<i32>} : memref<16x32xf32, #tpu.memory_space<vmem>>, vector<16x32xf32>,
    return
  }
}

</mosaic_0001>

<bundles_post_ra>
// kernel: tpu_custom_call.1
= control target key start
LH: loop header
LB: loop body
LE: loop exit
PB: predicated region body
PF: predicated region fallthrough
CT: control target
= control target key end

     0   :  { %8 = vsyncpa [#allocation3], 0  ;;  %s1406_s0 = inlined_call_operand.hbm [shape: f32[16,32], index: 0, kind: input, shape index: {}]   ;;  %s1407_s1 = inlined_call_operand.hbm [shape: f32[32,128], index: 1, kind: input, shape index: {}]   ;;  %s1408_s2 = inlined_call_operand.hbm [shape: f32[16,16], index: 2, kind: input, shape index: {}]   ;;  %s1409_s3 = inlined_call_operand.hbm [shape: f32[16,32], index: 3, kind: output, shape index: {}]  }
   0x1   :  { %9 = vsyncpa [#allocation6], 0 }
   0x2   :  { %10 = vsyncpa [#allocation4], 0  ;;  %s1238_s12 = smov [#allocation5]   ;;  %s1239_s14 = smov [#allocation2]  }
   0x3   :  { %s28_s13 = sshll.u32 %s1238_s12, 4  ;;  %s16_s15 = sshll.u32 %s1239_s14, 4  ;;  %s29_s13 = int_to_ptr.vmem [resolvable:$true] %s28_s13  ;;  %s17_s15 = int_to_ptr.vmem [resolvable:$true] %s16_s15 }
   0x4   :  { %s1160_s16 = scalar_lea.vmem %s29_s13, 512  ;;  %p1165_p1 = scmp.lt.s32.totalorder %s29_s13, %s29_s13 }
   0x5   :  { %p1161_p0 = scmp.ne.s32.totalorder %s29_s13, %s1160_s16  ;;  %p1166_p2 = scmp.lt.s32.totalorder %s1160_s16, %s1160_s16 }
   0x7   :  { %p1167_p3 = por %p1166_p2, %p1165_p1 }
   0x9   :  { %p1168_p4 = pnand %p1167_p3, %p1161_p0 }
   0xb   :  { %1171 = shalt.err (!%p1168_p4)
}
   0xc   :  { %s1240_s17 = smov 128   ;;  %s1241_s18 = smov 8  }
   0xd   :  { %34 = dma.hbm_to_vmem [thread:$0]  %s1407_s1, 512, %s29_s13, [#allocation6], %s1240_s17, %s1240_s17, %s1241_s18  }
   0xe   :  { %s1180_s21 = scalar_lea.vmem %s17_s15, 256  ;;  %p1185_p6 = scmp.lt.s32.totalorder %s17_s15, %s17_s15 }
   0xf   :  { %p1181_p5 = scmp.ne.s32.totalorder %s17_s15, %s1180_s21  ;;  %p1186_p7 = scmp.lt.s32.totalorder %s1180_s21, %s1180_s21 }
  0x11   :  { %p1187_p8 = por %p1186_p7, %p1185_p6 }
  0x13   :  { %p1188_p9 = pnand %p1187_p8, %p1181_p5 }
  0x15   :  { %1191 = shalt.err (!%p1188_p9)
}
  0x16   :  { %22 = dma.hbm_to_vmem [thread:$0]  %s1406_s0, 256, %s17_s15, [#allocation3], %s1240_s17, %s1240_s17, %s1241_s18  }
  0x17   :  { %s1242_s24 = smov [#allocation7]  }
  0x18   :  { %s40_s25 = sshll.u32 %s1242_s24, 4  ;;  %s41_s25 = int_to_ptr.vmem [resolvable:$true] %s40_s25 }
  0x19   :  { %s1200_s26 = scalar_lea.vmem %s41_s25, 256  ;;  %p1205_p11 = scmp.lt.s32.totalorder %s41_s25, %s41_s25 }
  0x1a   :  { %p1201_p10 = scmp.ne.s32.totalorder %s41_s25, %s1200_s26  ;;  %p1206_p12 = scmp.lt.s32.totalorder %s1200_s26, %s1200_s26 }
  0x1c   :  { %p1207_p13 = por %p1206_p12, %p1205_p11 }
  0x1e   :  { %p1208_p0 = pnand %p1207_p13, %p1201_p10 }
  0x20   :  { %1211 = shalt.err (!%p1208_p0)
}
  0x21   :  { %46 = dma.hbm_to_vmem [thread:$0]  %s1408_s2, 256, %s41_s25, [#allocation6], %s1240_s17, %s1240_s17, %s1241_s18  }
  0x22   :  { %1232 = dma.done.wait [#allocation3], 256  }
  0x23   :  { %1233 = vsyncadd [#allocation3], 4294967040 }
  0x24   :  { %1234 = dma.done.wait [#allocation6], 768  }
  0x25   :  { %1235 = vsyncadd [#allocation6], 4294966528  ;;  %vm64_vm0 = vcmask 261120   ;;  %v63_v0 = vld [vmem:[#allocation5 + $0x18] sm:$0xff]  ;;  %v62_v1 = vld [vmem:[#allocation5 + $0x10] sm:$0xff]  ;;  %vm170_vm1 = vcmask 64512  }
  0x26   :  { %1049 = vmatprep.subr.mxu0 %v63_v0  ;;  %v56_v2 = vld [vmem:[#allocation2] sm:$0xff]  ;;  %v61_v3 = vld [vmem:[#allocation5 + $0x8] sm:$0xff]  ;;  %v60_v4 = vld [vmem:[#allocation5] sm:$0xff]  ;;  %s1243_s0 = smov 88   ;;  %s1244_s2 = smov 96   ;;  %vm256_vm2 = vcmask 130048  }
  0x27   :  { %1050 = vmatpush3.msra.mxu0 %v63_v0  ;;  %1057 = vmatprep.mubr.msk.f32.mxu0 %vm64_vm0, %v56_v2  ;;  %v57_v5 = vld [vmem:[#allocation2 + $0x8] sm:$0xff]  ;;  %s1245_s28 = smov 120   ;;  %s1246_s29 = smov 32   ;;  %v1333_v22 = vld [vmem:[#allocation7 + $0x8] sm:$0xff]  ;;  %v1335_v24 = vld [vmem:[#allocation7] sm:$0xff]  ;;  %vm962_vm3 = vcmask 195584  }
  0x28   :  { %1051 = vmatprep.subr.mxu0 %v62_v1  ;;  %s1247_s30 = smov 64   ;;  %s1248_s4 = smov 56  }
  0x29   :  { %1052 = vmatpush3.msra.mxu0 %v62_v1  ;;  %s1249_s5 = smov 80   ;;  %s1250_s6 = smov 112  }
  0x2a   :  { %1053 = vmatprep.subr.mxu0 %v61_v3  ;;  %s1251_s7 = smov 48   ;;  %s1252_s8 = smov 72  }
  0x2b   :  { %1054 = vmatpush3.msra.mxu0 %v61_v3  ;;  %s1253_s9 = smov 104   ;;  %s1254_s10 = smov 40  }
  0x2c   :  { %1055 = vmatprep.subr.mxu0 %v60_v4  ;;  %s1255_s11 = smov 16   ;;  %s1256_s12 = smov 24  }
  0x2d   :  { %1056 = vmatpush3.msra.mxu0 %v60_v4  ;;  %s1257_s13 = smov [#allocation8]  }
  0x2e   :  { %1058 = vmatmul.mubr.msk.f32.vlgmr.msra.gmra.mxu0 %vm64_vm0, %v57_v5  ;;  %s972_s14 = sshll.u32 %s1257_s13, 4  ;;  %s973_s14 = int_to_ptr.vmem [resolvable:$true] %s972_s14 }
  0x2f   :  { %s1212_s15 = scalar_lea.vmem %s973_s14, 256  ;;  %p1217_p2 = scmp.lt.s32.totalorder %s973_s14, %s973_s14 }
  0x30   :  { %p1213_p1 = scmp.ne.s32.totalorder %s973_s14, %s1212_s15  ;;  %p1218_p3 = scmp.lt.s32.totalorder %s1212_s15, %s1212_s15 }
  0x32   :  { %p1219_p4 = por %p1218_p3, %p1217_p2 }
  0x34   :  { %p1220_p5 = pnand %p1219_p4, %p1213_p1 }
  0xee   :  { %v1298_v6 = vpop.f32.mrf.mxu0 }
  0xef   :  { %364 = vrot.lane.b32.xlu1 %v1298_v6, %s1243_s0  ;;  %168 = vrot.lane.b32.xlu0 %v1298_v6, %s1244_s2 }
  0xf0   :  { %v1302_v7 = vpop.f32.mrf.mxu0 }
  0xf1   :  { %1064 = vmatprep.mubr.msk.f32.mxu1 %vm170_vm1, %v1302_v7 }
  0xf3   :  { %362 = vrot.lane.b32.xlu1 %v1302_v7, %s1243_s0  ;;  %166 = vrot.lane.b32.xlu0 %v1302_v7, %s1244_s2 }
  0xf7   :  { %360 = vrot.lane.b32.xlu1 %v1298_v6, %s1245_s28  ;;  %358 = vrot.lane.b32.xlu0 %v1302_v7, %s1245_s28 }
  0xfb   :  { %148 = vrot.lane.b32.xlu1 %v1302_v7, %s1246_s29  ;;  %150 = vrot.lane.b32.xlu0 %v1298_v6, %s1246_s29 }
 0x161   :  { %v365_v8 = vpop.permute.xlu1 %364  ;;  %v169_v9 = vpop.permute.xlu0 %168 }
 0x162   :  { %1060 = vmatprep.subr.msk.mxu1 %vm170_vm1, %v169_v9 }
 0x163   :  { %1061 = vmatpush3.xpose.msk.msra.mxu1 %vm170_vm1, %v169_v9 }
 0x165   :  { %v363_v10 = vpop.permute.xlu1 %362  ;;  %v167_v11 = vpop.permute.xlu0 %166 }
 0x166   :  { %1062 = vmatprep.subr.msk.mxu1 %vm170_vm1, %v167_v11 }
 0x167   :  { %1063 = vmatpush3.xpose.msk.msra.mxu1 %vm170_vm1, %v167_v11 }
 0x168   :  { %1074 = vmatprep.subr.msk.mxu1 %vm170_vm1, %v365_v8 }
 0x169   :  { %v361_v12 = vpop.permute.xlu1 %360  ;;  %v359_v13 = vpop.permute.xlu0 %358 }
 0x16a   :  { %1065 = vmatmul.mubr.msk.f32.vlgmr.msra.gmra.mxu1 %vm170_vm1, %v1298_v6 }
 0x16b   :  { %1075 = vmatpush3.xpose.msk.msra.mxu1 %vm170_vm1, %v365_v8  ;;  %1078 = vmatprep.mubr.msk.f32.mxu1 %vm170_vm1, %v359_v13 }
 0x16c   :  { %1076 = vmatprep.subr.msk.mxu1 %vm170_vm1, %v363_v10 }
 0x16d   :  { %v149_v14 = vpop.permute.xlu1 %148  ;;  %v151_v15 = vpop.permute.xlu0 %150 }
 0x16e   :  { %v154_v16 = vmul.f32 %v149_v14, %v56_v2  ;;  %v155_v17 = vmul.f32 %v151_v15, %v57_v5 }
 0x16f   :  { %1077 = vmatpush3.xpose.msk.msra.mxu1 %vm170_vm1, %v363_v10 }
 0x170   :  { %158 = vrot.lane.b32.xlu1 %v154_v16, %s1247_s30  ;;  %160 = vrot.lane.b32.xlu0 %v155_v17, %s1247_s30 }
 0x172   :  { %1079 = vmatmul.mubr.msk.f32.vlgmr.msra.gmra.mxu1 %vm170_vm1, %v361_v12 }
 0x1e2   :  { %v159_v18 = vpop.permute.xlu1 %158  ;;  %v161_v19 = vpop.permute.xlu0 %160 }
 0x1e3   :  { %v1325_v20 = vadd.f32 %v159_v18, %v1302_v7  ;;  %v1328_v21 = vadd.f32 %v1298_v6, %v161_v19 }
 0x1e5   :  { %271 = vrot.lane.b32.xlu0 %v1325_v20, %s1247_s30  ;;  %273 = vrot.lane.b32.xlu1 %v1328_v21, %s1247_s30 }
 0x1e9   :  { %465 = vrot.lane.b32.xlu1 %v1328_v21, %s1248_s4 }
 0x22a   :  { %v1066_v23 = vpop.f32.mrf.mxu1 }
 0x22b   :  { %v255_v25 = vmul.f32 %v1066_v23, %v1333_v22 }
 0x22c   :  { %v245_v26 = vpop.f32.mrf.mxu1 }
 0x22d   :  { %v254_v27 = vmul.f32 %v245_v26, %v1335_v24  ;;  %v260_v28 = vsel %vm256_vm2, %v255_v25, 0.0 }
 0x22e   :  { %261 = vadd.xlane.f32.xlu1 %v260_v28 }
 0x22f   :  { %v257_v29 = vsel %vm256_vm2, %v254_v27, 0.0 }
 0x230   :  { %258 = vadd.xlane.f32.xlu0 %v257_v29 }
 0x232   :  { %v1080_v30 = vpop.f32.mrf.mxu1 }
 0x233   :  { %v450_v31 = vmul.f32 %v1080_v30, %v1333_v22 }
 0x234   :  { %v440_v32 = vpop.f32.mrf.mxu1 }
 0x235   :  { %v449_v33 = vmul.f32 %v440_v32, %v1335_v24  ;;  %v454_v34 = vsel %vm256_vm2, %v450_v31, 0.0 }
 0x236   :  { %455 = vadd.xlane.f32.xlu0 %v454_v34 }
 0x237   :  { %v451_v35 = vsel %vm256_vm2, %v449_v33, 0.0 }
 0x23a   :  { %452 = vadd.xlane.f32.xlu0 %v451_v35 }
 0x23f   :  { %463 = vrot.lane.b32.xlu1 %v1325_v20, %s1248_s4 }
 0x243   :  { %554 = vrot.lane.b32.xlu1 %v1302_v7, %s1249_s5 }
 0x247   :  { %552 = vrot.lane.b32.xlu1 %v1298_v6, %s1250_s6 }
 0x24b   :  { %655 = vrot.lane.b32.xlu1 %v1325_v20, %s1251_s7 }
 0x250   :  { %556 = vrot.lane.b32.xlu0 %v1298_v6, %s1249_s5 }
 0x254   :  { %550 = vrot.lane.b32.xlu0 %v1302_v7, %s1250_s6 }
 0x257   :  { %v274_v36 = vpop.permute.xlu1 %273  ;;  %v272_v37 = vpop.permute.xlu0 %271 }
 0x258   :  { %1067 = vmatprep.subr.mxu0 %v274_v36  ;;  %657 = vrot.lane.b32.xlu0 %v1328_v21, %s1251_s7 }
 0x259   :  { %1068 = vmatpush3.msra.mxu0 %v274_v36 }
 0x25a   :  { %1069 = vmatprep.subr.mxu0 %v272_v37 }
 0x25b   :  { %v466_v38 = vpop.permute.xlu1 %465  ;;  %1070 = vmatpush3.msra.mxu0 %v272_v37 }
 0x25c   :  { %1081 = vmatprep.subr.mxu0 %v466_v38 }
 0x2b7   :  { %v262_v39 = vpop.xlane.xlu1 %261 }
 0x2b8   :  { %v264_v40 = vadd.f32 1e-06, %v262_v39 }
 0x2b9   :  { %v259_v41 = vpop.xlane.xlu0 %258 }
 0x2ba   :  { %v263_v42 = vadd.f32 1e-06, %v259_v41  ;;  %1136 = vrcp.f32 %v264_v40 }
 0x2bb   :  { %v464_v43 = vpop.permute.xlu1 %463 }
 0x2bc   :  { %1138 = vrcp.f32 %v263_v42 }
 0x2bf   :  { %v456_v44 = vpop.xlane.xlu0 %455  ;;  %v555_v48 = vpop.permute.xlu1 %554 }
 0x2c0   :  { %v458_v45 = vadd.f32 1e-06, %v456_v44 }
 0x2c2   :  { %1140 = vrcp.f32 %v458_v45 }
 0x2c3   :  { %v453_v46 = vpop.xlane.xlu0 %452  ;;  %v553_v53 = vpop.permute.xlu1 %552 }
 0x2c4   :  { %v457_v47 = vadd.f32 1e-06, %v453_v46 }
 0x2c6   :  { %1142 = vrcp.f32 %v457_v47 }
 0x2c7   :  { %v557_v49 = vpop.permute.xlu0 %556  ;;  %v1137_v50 = vpop.eup %1136 }
 0x2c8   :  { %v268_v55 = vmul.f32 %v1137_v50, %v255_v25  ;;  %v656_v57 = vpop.permute.xlu1 %655 }
 0x2c9   :  { %v1139_v51 = vpop.eup %1138 }
 0x2ca   :  { %v266_v52 = vmul.f32 %v1139_v51, %v254_v27 }
 0x2cb   :  { %v551_v54 = vpop.permute.xlu0 %550 }
 0x2cc   :  { %1071 = vmatprep.mubr.msk.f32.mxu0 %vm256_vm2, %v266_v52 }
 0x2cd   :  { %1072 = vmatmul.mubr.msk.f32.vlgmr.msra.gmra.mxu0 %vm256_vm2, %v268_v55 }
 0x2ce   :  { %1082 = vmatpush3.msra.mxu0 %v466_v38 }
 0x2cf   :  { %1083 = vmatprep.subr.mxu0 %v464_v43  ;;  %v658_v56 = vpop.permute.xlu0 %657  ;;  %v1141_v58 = vpop.eup %1140 }
 0x2d0   :  { %1084 = vmatpush3.msra.mxu0 %v464_v43  ;;  %1095 = vmatprep.subr.mxu1 %v658_v56  ;;  %v462_v61 = vmul.f32 %v1141_v58, %v450_v31 }
 0x2d1   :  { %1088 = vmatprep.subr.msk.mxu0 %vm170_vm1, %v557_v49  ;;  %1096 = vmatpush3.msra.mxu1 %v658_v56 }
 0x2d2   :  { %1097 = vmatprep.subr.mxu1 %v656_v57 }
 0x2d3   :  { %v1143_v59 = vpop.eup %1142  ;;  %1098 = vmatpush3.msra.mxu1 %v656_v57 }
 0x2d4   :  { %v460_v60 = vmul.f32 %v1143_v59, %v449_v33 }
 0x2d6   :  { %1085 = vmatprep.mubr.msk.f32.mxu0 %vm256_vm2, %v460_v60 }
 0x2d7   :  { %1086 = vmatmul.mubr.msk.f32.vlgmr.msra.gmra.mxu0 %vm256_vm2, %v462_v61 }
 0x2d8   :  { %1089 = vmatpush3.xpose.msk.msra.mxu0 %vm170_vm1, %v557_v49  ;;  %1092 = vmatprep.mubr.msk.f32.mxu0 %vm170_vm1, %v551_v54 }
 0x2d9   :  { %1090 = vmatprep.subr.msk.mxu0 %vm170_vm1, %v555_v48 }
 0x2dc   :  { %1091 = vmatpush3.xpose.msk.msra.mxu0 %vm170_vm1, %v555_v48 }
 0x2df   :  { %1093 = vmatmul.mubr.msk.f32.vlgmr.msra.gmra.mxu0 %vm170_vm1, %v553_v53 }
 0x38d   :  { %v1362_v62 = vpop.f32.mrf.mxu0 }
 0x38f   :  { %v1364_v63 = vpop.f32.mrf.mxu0 }
 0x397   :  { %v1087_v0 = vpop.f32.mrf.mxu0 }
 0x399   :  { %v541_v1 = vpop.f32.mrf.mxu0 }
 0x39f   :  { %v1094_v2 = vpop.f32.mrf.mxu0 }
 0x3a0   :  { %v642_v3 = vmul.f32 %v1094_v2, %v1333_v22 }
 0x3a1   :  { %v632_v4 = vpop.f32.mrf.mxu0 }
 0x3a2   :  { %v641_v5 = vmul.f32 %v632_v4, %v1335_v24  ;;  %v646_v8 = vsel %vm256_vm2, %v642_v3, 0.0 }
 0x3a3   :  { %647 = vadd.xlane.f32.xlu1 %v646_v8 }
 0x3a4   :  { %v643_v9 = vsel %vm256_vm2, %v641_v5, 0.0 }
 0x3a5   :  { %644 = vadd.xlane.f32.xlu0 %v643_v9 }
 0x3b4   :  { %746 = vrot.lane.b32.xlu1 %v1302_v7, %s1252_s8 }
 0x3b8   :  { %744 = vrot.lane.b32.xlu1 %v1298_v6, %s1253_s9 }
 0x3bb   :  { %748 = vrot.lane.b32.xlu0 %v1298_v6, %s1252_s8 }
 0x3bf   :  { %742 = vrot.lane.b32.xlu0 %v1302_v7, %s1253_s9 }
 0x42c   :  { %v648_v10 = vpop.xlane.xlu1 %647 }
 0x42d   :  { %v650_v11 = vadd.f32 1e-06, %v648_v10 }
 0x42e   :  { %v645_v12 = vpop.xlane.xlu0 %644 }
 0x42f   :  { %v649_v13 = vadd.f32 1e-06, %v645_v12  ;;  %1144 = vrcp.f32 %v650_v11 }
 0x430   :  { %v747_v6 = vpop.permute.xlu1 %746 }
 0x431   :  { %1146 = vrcp.f32 %v649_v13 }
 0x432   :  { %v749_v14 = vpop.permute.xlu0 %748 }
 0x433   :  { %1102 = vmatprep.subr.msk.mxu1 %vm170_vm1, %v749_v14 }
 0x434   :  { %v745_v7 = vpop.permute.xlu1 %744 }
 0x436   :  { %v743_v19 = vpop.permute.xlu0 %742 }
 0x43c   :  { %v1145_v15 = vpop.eup %1144 }
 0x43d   :  { %v654_v18 = vmul.f32 %v1145_v15, %v642_v3 }
 0x43e   :  { %v1147_v16 = vpop.eup %1146 }
 0x43f   :  { %v652_v17 = vmul.f32 %v1147_v16, %v641_v5 }
 0x441   :  { %1099 = vmatprep.mubr.msk.f32.mxu1 %vm256_vm2, %v652_v17 }
 0x442   :  { %1100 = vmatmul.mubr.msk.f32.vlgmr.msra.gmra.mxu1 %vm256_vm2, %v654_v18 }
 0x443   :  { %1103 = vmatpush3.xpose.msk.msra.mxu1 %vm170_vm1, %v749_v14  ;;  %1106 = vmatprep.mubr.msk.f32.mxu1 %vm170_vm1, %v743_v19 }
 0x444   :  { %1104 = vmatprep.subr.msk.mxu1 %vm170_vm1, %v747_v6 }
 0x447   :  { %1105 = vmatpush3.xpose.msk.msra.mxu1 %vm170_vm1, %v747_v6 }
 0x44a   :  { %1107 = vmatmul.mubr.msk.f32.vlgmr.msra.gmra.mxu1 %vm170_vm1, %v745_v7 }
 0x502   :  { %v1101_v23 = vpop.f32.mrf.mxu1 }
 0x504   :  { %v733_v25 = vpop.f32.mrf.mxu1 }
 0x50a   :  { %v1108_v26 = vpop.f32.mrf.mxu1 }
 0x50b   :  { %v834_v27 = vmul.f32 %v1108_v26, %v1333_v22 }
 0x50c   :  { %v824_v28 = vpop.f32.mrf.mxu1 }
 0x50d   :  { %v833_v29 = vmul.f32 %v824_v28, %v1335_v24  ;;  %v838_v30 = vsel %vm256_vm2, %v834_v27, 0.0 }
 0x50e   :  { %839 = vadd.xlane.f32.xlu1 %v838_v30 }
 0x50f   :  { %v835_v31 = vsel %vm256_vm2, %v833_v29, 0.0 }
 0x510   :  { %836 = vadd.xlane.f32.xlu0 %v835_v31 }
 0x51f   :  { %847 = vrot.lane.b32.xlu1 %v1325_v20, %s1254_s10 }
 0x523   :  { %938 = vrot.lane.b32.xlu1 %v1087_v0, %s1241_s18 }
 0x526   :  { %849 = vrot.lane.b32.xlu0 %v1328_v21, %s1254_s10 }
 0x527   :  { %946 = vrot.lane.b32.xlu1 %v1101_v23, %s1255_s11 }
 0x52a   :  { %936 = vrot.lane.b32.xlu0 %v541_v1, %s1241_s18 }
 0x52e   :  { %944 = vrot.lane.b32.xlu0 %v733_v25, %s1255_s11 }
 0x597   :  { %v840_v22 = vpop.xlane.xlu1 %839 }
 0x598   :  { %v842_v24 = vadd.f32 1e-06, %v840_v22 }
 0x599   :  { %v837_v32 = vpop.xlane.xlu0 %836 }
 0x59a   :  { %v841_v33 = vadd.f32 1e-06, %v837_v32  ;;  %1148 = vrcp.f32 %v842_v24 }
 0x59b   :  { %v848_v35 = vpop.permute.xlu1 %847 }
 0x59c   :  { %1150 = vrcp.f32 %v841_v33 }
 0x59d   :  { %v850_v34 = vpop.permute.xlu0 %849 }
 0x59e   :  { %1109 = vmatprep.subr.mxu0 %v850_v34 }
 0x59f   :  { %1110 = vmatpush3.msra.mxu0 %v850_v34  ;;  %v939_v40 = vpop.permute.xlu1 %938 }
 0x5a0   :  { %1111 = vmatprep.subr.mxu0 %v848_v35  ;;  %v959_v44 = vsel %vm170_vm1, %v1362_v62, %v939_v40 }
 0x5a1   :  { %1112 = vmatpush3.msra.mxu0 %v848_v35  ;;  %v937_v41 = vpop.permute.xlu0 %936 }
 0x5a2   :  { %v958_v47 = vsel %vm170_vm1, %v1364_v63, %v937_v41 }
 0x5a3   :  { %v947_v42 = vpop.permute.xlu1 %946 }
 0x5a4   :  { %v961_v45 = vsel %vm256_vm2, %v959_v44, %v947_v42 }
 0x5a5   :  { %v945_v43 = vpop.permute.xlu0 %944 }
 0x5a6   :  { %v960_v49 = vsel %vm256_vm2, %v958_v47, %v945_v43 }
 0x5a7   :  { %v1149_v20 = vpop.eup %1148 }
 0x5a8   :  { %v846_v37 = vmul.f32 %v1149_v20, %v834_v27 }
 0x5a9   :  { %v1151_v36 = vpop.eup %1150 }
 0x5aa   :  { %v844_v21 = vmul.f32 %v1151_v36, %v833_v29 }
 0x5ac   :  { %1113 = vmatprep.mubr.msk.f32.mxu0 %vm256_vm2, %v844_v21 }
 0x5ad   :  { %1114 = vmatmul.mubr.msk.f32.vlgmr.msra.gmra.mxu0 %vm256_vm2, %v846_v37 }
 0x66d   :  { %v1115_v38 = vpop.f32.mrf.mxu0 }
 0x66e   :  { %954 = vrot.lane.b32.xlu1 %v1115_v38, %s1256_s12 }
 0x66f   :  { %v925_v39 = vpop.f32.mrf.mxu0 }
 0x670   :  { %952 = vrot.lane.b32.xlu0 %v925_v39, %s1256_s12 }
 0x6e0   :  { %v955_v46 = vpop.permute.xlu1 %954 }
 0x6e1   :  { %v964_v48 = vsel %vm962_vm3, %v961_v45, %v955_v46 }
 0x6e2   :  { %966 = vst.msk [vmem:[#allocation8 + $0x8] sm:$0xff] %vm64_vm0, %v964_v48  ;;  %v953_v50 = vpop.permute.xlu0 %952 }
 0x6e3   :  { %v963_v51 = vsel %vm962_vm3, %v960_v49, %v953_v50 }
 0x6e4   :  { %965 = vst.msk [vmem:[#allocation8] sm:$0xff] %vm64_vm0, %v963_v51 }
 0x6e5   :  { %1223 = shalt.err (!%p1220_p5)
}
 0x6e6   :  { %978 = dma.vmem_to_hbm [thread:$0]  %s973_s14, 256, %s1409_s3, [#allocation4], %s1240_s17, %s1240_s17, %s1241_s18  }
 0x6e7   :  { %1236 = dma.done.wait [#allocation4], 256  }
 0x6e8   :  { %1237 = vsyncadd [#allocation4], 4294967040 }
 0x6e9   :  { %982 = vsyncpa [#allocation3], 1 }
 0x6ea   :  { %983 = vsyncpa [#allocation6], 1 }
 0x6eb   :  { %984 = vsyncpa [#allocation4], 1 }

</bundles_post_ra>
